<compile_context>
chip_gen: v5e
topology: v5e:2x2
jax: 0.10.0
libtpu: 0.0.40
codegen_flags: <defaults>
</compile_context>

<pallas_src>
import functools

import jax
import jax.numpy as jnp
from jax.experimental import pallas as pl
from jax.experimental.pallas import tpu as pltpu

_LANE = 128


def _round_up(n, m):
    return ((n + m - 1) // m) * m


def _policy_mlp_kernel(x_ref, w1_ref, b1_ref, w2_ref, b2_ref, w3_ref, b3_ref,
                       o_ref, *, bf16_act):
    # x tile arrives f32 (TB, D); weights are bf16; the three dots accumulate
    # in f32 on the MXU.  bias-add stays f32; tanh runs in bf16 on v6e/v7x
    # (bf16 EUP) and in f32 on v5e.
    x = x_ref[...].astype(jnp.bfloat16)

    z1 = jnp.dot(x, w1_ref[...], preferred_element_type=jnp.float32) + b1_ref[...]
    if bf16_act:
        h1 = jnp.tanh(z1.astype(jnp.bfloat16))
    else:
        h1 = jnp.tanh(z1).astype(jnp.bfloat16)

    z2 = jnp.dot(h1, w2_ref[...], preferred_element_type=jnp.float32) + b2_ref[...]
    if bf16_act:
        h2 = jnp.tanh(z2.astype(jnp.bfloat16))
    else:
        h2 = jnp.tanh(z2).astype(jnp.bfloat16)

    z3 = jnp.dot(h2, w3_ref[...], preferred_element_type=jnp.float32) + b3_ref[...]
    if bf16_act:
        y = jnp.tanh(z3.astype(jnp.bfloat16))
    else:
        y = jnp.tanh(z3)
    o_ref[...] = y.astype(o_ref.dtype)


def _bf16_activations_supported():
    """bf16 EUP/VPU path exists on v6e/v7x; v5e and older are f32-only."""
    try:
        kind = jax.devices()[0].device_kind.lower()
    except Exception:
        return True
    return not any(tag in kind for tag in ("v2", "v3", "v4", "v5"))


def prepare_params(params):
    """One-time param prep: bf16 MXU weights, f32 biases, lane-padded out layer.

    Call this once outside the rollout/eval loop so per-call weight bytes are
    halved (bf16) and the final matmul/store are lane-dense (128 lanes).
    """
    w1, b1, w2, b2, w3, b3 = params
    a = w3.shape[1]
    a_pad = _round_up(a, _LANE)
    w3p = jnp.pad(w3, ((0, 0), (0, a_pad - a)))
    b3p = jnp.pad(b3, ((0, 0), (0, a_pad - a)))
    return (w1.astype(jnp.bfloat16), b1.astype(jnp.float32),
            w2.astype(jnp.bfloat16), b2.astype(jnp.float32),
            w3p.astype(jnp.bfloat16), b3p.astype(jnp.float32))


def policy_net_continuous(x, prepared_params, n_actions, *, tb=None):
    """x: (B, 1, input_dim) f32 -> (B, n_actions) f32.

    `prepared_params` must come from `prepare_params`.

    tb (batch tile, multiple of 8):
      * None (default): tb = whole 8-padded batch when B <= 256 (grid of 1,
        avoids per-step overhead at small RL batches), else tb = 256
        (>= 2 tiles so v7x megacore can split the batch, and the (tb, 256)
        intermediates stay below heavy vreg-spill pressure).
      * Explicit tb overrides the heuristic.  VMEM capacity is not the
        limiting factor on any generation; pick tb by spill / megacore split.
    """
    w1, b1, w2, b2, w3p, b3p = prepared_params
    B, _, D = x.shape
    H = w1.shape[1]
    A_pad = w3p.shape[1]

    B8 = _round_up(B, 8)
    if tb is None:
        tb = B8 if B8 <= 256 else 256
    else:
        tb = max(8, min(_round_up(tb, 8), B8))
    B_pad = _round_up(B, tb)
    if B_pad != B:
        x = jnp.pad(x, ((0, B_pad - B), (0, 0), (0, 0)))

    grid_steps = B_pad // tb
    grid = (grid_steps,)

    def _const(shape):
        # Constant block index -> Pallas keeps this operand resident in VMEM
        # across the whole batch grid (no per-tile re-DMA).
        zeros = (0,) * len(shape)
        return pl.BlockSpec(shape, lambda i: zeros)

    # x tiles are tiny (tb*D*4 B); with many grid steps give the input a
    # 3-deep pipeline so per-DMA latency is hidden.  Irrelevant at grid<=2.
    if grid_steps >= 3:
        x_spec = pl.BlockSpec((tb, None, D), lambda i: (i, 0, 0),
                              pipeline_mode=pl.Buffered(3))
    else:
        x_spec = pl.BlockSpec((tb, None, D), lambda i: (i, 0, 0))

    bf16_act = _bf16_activations_supported()

    cost = pl.CostEstimate(
        flops=2 * B_pad * (D * H + H * H + H * A_pad),
        transcendentals=B_pad * (H + H + A_pad),
        bytes_accessed=(B_pad * D * 4                       # x (f32)
                        + (D * H + H * H + H * A_pad) * 2   # bf16 weights
                        + (2 * H + A_pad) * 4               # f32 biases
                        + B_pad * A_pad * 2),               # bf16 output
    )

    out_padded = pl.pallas_call(
        functools.partial(_policy_mlp_kernel, bf16_act=bf16_act),
        # bf16 output halves the HBM writeback of the lane-padded slab; the
        # values are tanh outputs in [-1, 1] so bf16 is well within tolerance.
        out_shape=jax.ShapeDtypeStruct((B_pad, A_pad), jnp.bfloat16),
        grid=grid,
        in_specs=[
            # (TB, 1, D) block with the middle axis squeezed away -> kernel
            # sees a 2-D (TB, D) tile; no wrapper-side reshape needed.
            x_spec,
            _const((D, H)), _const((1, H)),
            _const((H, H)), _const((1, H)),
            _const((H, A_pad)), _const((1, A_pad)),
        ],
        out_specs=pl.BlockSpec((tb, A_pad), lambda i: (i, 0)),
        compiler_params=pltpu.CompilerParams(
            dimension_semantics=("parallel",),
            vmem_limit_bytes=32 * 1024 * 1024,
        ),
        cost_estimate=cost,
    )(x, w1, b1, w2, b2, w3p, b3p)

    # TODO(synk): consumers that can take the padded bf16 (B_pad, A_pad) slab
    # directly should skip this slice/cast to avoid an extra HBM pass.
    return out_padded[:B, :n_actions].astype(jnp.float32)


def init_params(key, input_dim, n_actions, hidden=256):
    """Deterministic parameter init mirroring the module's shapes.

    fc1/fc2 weights: xavier_normal_  (std = sqrt(2 / (fan_in + fan_out)))
    out weight/bias: small uniform (PyTorch default-ish); values are
    synthetic but deterministic.  Weights are stored as (in, out) so the
    kernel computes y = x @ W + b.
    """
    k1, k2, k3, k4 = jax.random.split(key, 4)
    std1 = (2.0 / (input_dim + hidden)) ** 0.5
    std2 = (2.0 / (hidden + hidden)) ** 0.5
    w1 = jax.random.normal(k1, (input_dim, hidden), jnp.float32) * std1
    w2 = jax.random.normal(k2, (hidden, hidden), jnp.float32) * std2
    bound3 = 1.0 / (hidden ** 0.5)
    w3 = jax.random.uniform(k3, (hidden, n_actions), jnp.float32,
                            -bound3, bound3)
    b1 = jnp.zeros((1, hidden), jnp.float32)
    b2 = jnp.zeros((1, hidden), jnp.float32)
    b3 = jax.random.uniform(k4, (1, n_actions), jnp.float32, -bound3, bound3)
    return (w1, b1, w2, b2, w3, b3)


def _reference(x, params):
    w1, b1, w2, b2, w3, b3 = params
    x2d = jnp.squeeze(x, axis=1)
    h1 = jnp.tanh(x2d @ w1 + b1)
    h2 = jnp.tanh(h1 @ w2 + b2)
    return jnp.tanh(h2 @ w3 + b3)


if __name__ == "__main__":
    key = jax.random.PRNGKey(0)
    k_x, k_p, k_x2 = jax.random.split(key, 3)

    input_dim, n_actions = 16, 4
    params = init_params(k_p, input_dim, n_actions)
    # One-time prep (bf16 weights, lane-padded output layer), amortized over
    # every subsequent forward call.
    prepared = prepare_params(params)

    # Config A: small batch -> auto tb = whole batch, grid of 1 (no per-step
    # overhead; the dominant regime for typical RL rollout batches).
    B = 64
    x = jax.random.normal(k_x, (B, 1, input_dim), jnp.float32)
    fwd = jax.jit(functools.partial(policy_net_continuous,
                                    n_actions=n_actions))
    out = jax.block_until_ready(fwd(x, prepared))
    ref = _reference(x, params)
    assert out.shape == (B, n_actions)
    # bf16 MXU operands / bf16 tanh (v6e+) / bf16 output vs f32 reference.
    assert jnp.allclose(out, ref, atol=3e-2, rtol=3e-2), float(
        jnp.max(jnp.abs(out - ref)))

    # Config B: non-multiple batch + explicit small tile -> multi-step grid,
    # exercising batch padding, resident-weight reuse across tiles and the
    # Buffered(3) input pipeline path.
    B2 = 300
    x2 = jax.random.normal(k_x2, (B2, 1, input_dim), jnp.float32)
    fwd2 = jax.jit(functools.partial(policy_net_continuous,
                                     n_actions=n_actions, tb=64))
    out2 = jax.block_until_ready(fwd2(x2, prepared))
    ref2 = _reference(x2, params)
    assert out2.shape == (B2, n_actions)
    assert jnp.allclose(out2, ref2, atol=3e-2, rtol=3e-2), float(
        jnp.max(jnp.abs(out2 - ref2)))

    print("KERNEL_OK")
</pallas_src>

<mosaic_0001>
module attributes {stable_mosaic.version = 11 : i64} {
  func.func @_policy_mlp_kernel(%arg0: i32, %arg1: memref<64x1x16xf32, #tpu.memory_space<vmem>>, %arg2: memref<16x256xbf16, #tpu.memory_space<vmem>>, %arg3: memref<1x256xf32, #tpu.memory_space<vmem>>, %arg4: memref<256x256xbf16, #tpu.memory_space<vmem>>, %arg5: memref<1x256xf32, #tpu.memory_space<vmem>>, %arg6: memref<256x128xbf16, #tpu.memory_space<vmem>>, %arg7: memref<1x128xf32, #tpu.memory_space<vmem>>, %arg8: memref<64x128xbf16, #tpu.memory_space<vmem>>) attributes {dimension_semantics = [#tpu.dimension_semantics<parallel>], iteration_bounds = array<i64: 1>, scalar_prefetch = 0 : i64, scratch_operands = 0 : i64, tpu.core_type = #tpu.core_type<tc>, window_params = [{transform_indices = @transform_0, window_bounds = array<i64: 64, 1, 16>}, {pipeline_mode = #tpu.pipeline_mode<synchronous>, transform_indices = @transform_1, window_bounds = array<i64: 16, 256>}, {pipeline_mode = #tpu.pipeline_mode<synchronous>, transform_indices = @transform_2, window_bounds = array<i64: 1, 256>}, {pipeline_mode = #tpu.pipeline_mode<synchronous>, transform_indices = @transform_3, window_bounds = array<i64: 256, 256>}, {pipeline_mode = #tpu.pipeline_mode<synchronous>, transform_indices = @transform_4, window_bounds = array<i64: 1, 256>}, {pipeline_mode = #tpu.pipeline_mode<synchronous>, transform_indices = @transform_5, window_bounds = array<i64: 256, 128>}, {pipeline_mode = #tpu.pipeline_mode<synchronous>, transform_indices = @transform_6, window_bounds = array<i64: 1, 128>}, {transform_indices = @transform_7, window_bounds = array<i64: 64, 128>}]} {
    %c0 = arith.constant 0 : index
    %c0_0 = arith.constant 0 : index
    %c0_1 = arith.constant 0 : index
    %0 = vector.load %arg1[%c0, %c0_0, %c0_1] : memref<64x1x16xf32, #tpu.memory_space<vmem>>, vector<64x1x16xf32>
    %1 = vector.shape_cast %0 : vector<64x1x16xf32> to vector<64x16xf32>
    %2 = arith.truncf %1 : vector<64x16xf32> to vector<64x16xbf16>
    %c0_2 = arith.constant 0 : index
    %c0_3 = arith.constant 0 : index
    %3 = vector.load %arg2[%c0_2, %c0_3] : memref<16x256xbf16, #tpu.memory_space<vmem>>, vector<16x256xbf16>
    %cst = arith.constant dense<0.000000e+00> : vector<64x256xf32>
    %4 = tpu.matmul %2, %3, %cst {dimension_numbers = #tpu.dot_dimension_numbers<[1], [0], [0], [1], [0, 0, 1, 1], [], []>} : vector<64x16xbf16>, vector<16x256xbf16>, vector<64x256xf32> -> vector<64x256xf32>
    %c0_4 = arith.constant 0 : index
    %c0_5 = arith.constant 0 : index
    %5 = vector.load %arg3[%c0_4, %c0_5] : memref<1x256xf32, #tpu.memory_space<vmem>>, vector<1x256xf32>
    %6 = vector.broadcast %5 : vector<1x256xf32> to vector<64x256xf32>
    %7 = arith.addf %4, %6 : vector<64x256xf32>
    %8 = arith.truncf %7 : vector<64x256xf32> to vector<64x256xbf16>
    %9 = math.tanh %8 : vector<64x256xbf16>
    %c0_6 = arith.constant 0 : index
    %c0_7 = arith.constant 0 : index
    %10 = vector.load %arg4[%c0_6, %c0_7] : memref<256x256xbf16, #tpu.memory_space<vmem>>, vector<256x256xbf16>
    %cst_8 = arith.constant dense<0.000000e+00> : vector<64x256xf32>
    %11 = tpu.matmul %9, %10, %cst_8 {dimension_numbers = #tpu.dot_dimension_numbers<[1], [0], [0], [1], [0, 0, 1, 1], [], []>} : vector<64x256xbf16>, vector<256x256xbf16>, vector<64x256xf32> -> vector<64x256xf32>
    %c0_9 = arith.constant 0 : index
    %c0_10 = arith.constant 0 : index
    %12 = vector.load %arg5[%c0_9, %c0_10] : memref<1x256xf32, #tpu.memory_space<vmem>>, vector<1x256xf32>
    %13 = vector.broadcast %12 : vector<1x256xf32> to vector<64x256xf32>
    %14 = arith.addf %11, %13 : vector<64x256xf32>
    %15 = arith.truncf %14 : vector<64x256xf32> to vector<64x256xbf16>
    %16 = math.tanh %15 : vector<64x256xbf16>
    %c0_11 = arith.constant 0 : index
    %c0_12 = arith.constant 0 : index
    %17 = vector.load %arg6[%c0_11, %c0_12] : memref<256x128xbf16, #tpu.memory_space<vmem>>, vector<256x128xbf16>
    %cst_13 = arith.constant dense<0.000000e+00> : vector<64x128xf32>
    %18 = tpu.matmul %16, %17, %cst_13 {dimension_numbers = #tpu.dot_dimension_numbers<[1], [0], [0], [1], [0, 0, 1, 1], [], []>} : vector<64x256xbf16>, vector<256x128xbf16>, vector<64x128xf32> -> vector<64x128xf32>
    %c0_14 = arith.constant 0 : index
    %c0_15 = arith.constant 0 : index
    %19 = vector.load %arg7[%c0_14, %c0_15] : memref<1x128xf32, #tpu.memory_space<vmem>>, vector<1x128xf32>
    %20 = vector.broadcast %19 : vector<1x128xf32> to vector<64x128xf32>
    %21 = arith.addf %18, %20 : vector<64x128xf32>
    %22 = arith.truncf %21 : vector<64x128xf32> to vector<64x128xbf16>
    %23 = math.tanh %22 : vector<64x128xbf16>
    %c0_16 = arith.constant 0 : index
    %c0_17 = arith.constant 0 : index
    %24 = vector.load %arg8[%c0_16, %c0_17] : memref<64x128xbf16, #tpu.memory_space<vmem>>, vector<64x128xbf16>
    tpu.vector_store %arg8[%c0_16, %c0_17], %23 {strides = array<i32>} : memref<64x128xbf16, #tpu.memory_space<vmem>>, vector<64x128xbf16>,
    return
  }
  func.func @transform_0(%arg0: i32) -> (i32, i32, i32) {
    %c0_i32 = arith.constant 0 : i32
    %c0_i32_0 = arith.constant 0 : i32
    %c0_i32_1 = arith.constant 0 : i32
    return %arg0, %c0_i32, %c0_i32_0 : i32, i32, i32
  }
  func.func @transform_1(%arg0: i32) -> (i32, i32) {
    %c0_i32 = arith.constant 0 : i32
    %c0_i32_0 = arith.constant 0 : i32
    %c0_i32_1 = arith.constant 0 : i32
    return %c0_i32, %c0_i32_0 : i32, i32
  }
  func.func @transform_2(%arg0: i32) -> (i32, i32) {
    %c0_i32 = arith.constant 0 : i32
    %c0_i32_0 = arith.constant 0 : i32
    %c0_i32_1 = arith.constant 0 : i32
    return %c0_i32, %c0_i32_0 : i32, i32
  }
  func.func @transform_3(%arg0: i32) -> (i32, i32) {
    %c0_i32 = arith.constant 0 : i32
    %c0_i32_0 = arith.constant 0 : i32
    %c0_i32_1 = arith.constant 0 : i32
    return %c0_i32, %c0_i32_0 : i32, i32
  }
  func.func @transform_4(%arg0: i32) -> (i32, i32) {
    %c0_i32 = arith.constant 0 : i32
    %c0_i32_0 = arith.constant 0 : i32
    %c0_i32_1 = arith.constant 0 : i32
    return %c0_i32, %c0_i32_0 : i32, i32
  }
  func.func @transform_5(%arg0: i32) -> (i32, i32) {
    %c0_i32 = arith.constant 0 : i32
    %c0_i32_0 = arith.constant 0 : i32
    %c0_i32_1 = arith.constant 0 : i32
    return %c0_i32, %c0_i32_0 : i32, i32
  }
  func.func @transform_6(%arg0: i32) -> (i32, i32) {
    %c0_i32 = arith.constant 0 : i32
    %c0_i32_0 = arith.constant 0 : i32
    %c0_i32_1 = arith.constant 0 : i32
    return %c0_i32, %c0_i32_0 : i32, i32
  }
  func.func @transform_7(%arg0: i32) -> (i32, i32) {
    %c0_i32 = arith.constant 0 : i32
    %c0_i32_0 = arith.constant 0 : i32
    return %arg0, %c0_i32 : i32, i32
  }
}

</mosaic_0001>

<bundles_post_ra>
// kernel: policy_net_continuous.1
= control target key start
LH: loop header
LB: loop body
LE: loop exit
PB: predicated region body
PF: predicated region fallthrough
CT: control target
= control target key end

     0   :  { %12 = vsyncpa [#allocation3], 0  ;;  %s1978_s0 = inlined_call_operand.vmem [shape: f32[64,1,16], index: 0, kind: input, shape index: {}]   ;;  %s1979_s1 = inlined_call_operand.vmem [shape: bf16[16,256], index: 1, kind: input, shape index: {}]   ;;  %s1980_s2 = inlined_call_operand.vmem [shape: f32[1,256], index: 2, kind: input, shape index: {}]   ;;  %s1981_s3 = inlined_call_operand.hbm [shape: bf16[256,256], index: 3, kind: input, shape index: {}]   ;;  %s1982_s4 = inlined_call_operand.vmem [shape: f32[1,256], index: 4, kind: input, shape index: {}]   ;;  %s1983_s5 = inlined_call_operand.hbm [shape: bf16[256,128], index: 5, kind: input, shape index: {}]   ;;  %s1984_s6 = inlined_call_operand.vmem [shape: f32[1,128], index: 6, kind: input, shape index: {}]   ;;  %s1985_s7 = inlined_call_operand.vmem [shape: bf16[64,128], index: 7, kind: output, shape index: {}]  }
   0x1   :  { %s24_s26 = sshll.u32 %s1981_s3, 4  ;;  %s25_s26 = int_to_ptr.hbm [resolvable:$true] %s24_s26 }
   0x2   :  { %13 = vsyncpa [#allocation5], 0  ;;  %s1593_s27 = smov [#allocation2]   ;;  %s39_s8 = sshll.u32 %s1983_s5, 4  ;;  %s40_s8 = int_to_ptr.hbm [resolvable:$true] %s39_s8 }
   0x3   :  { %s26_s28 = sshll.u32 %s1593_s27, 4  ;;  %s1594_s9 = smov 128   ;;  %s27_s28 = int_to_ptr.vmem [resolvable:$true] %s26_s28 }
   0x4   :  { %s1595_s10 = smov 8   ;;  %s1596_s11 = smov [#allocation4]  }
   0x5   :  { %32 = dma.hbm_to_vmem [thread:$0]  %s25_s26, 4096, %s27_s28, [#allocation3], %s1594_s9, %s1594_s9, %s1595_s10  }
   0x6   :  { %s41_s12 = sshll.u32 %s1596_s11, 4  ;;  %s1597_s13 = smov 64   ;;  %s42_s12 = int_to_ptr.vmem [resolvable:$true] %s41_s12 }
   0x7   :  { %s1598_s14 = smov 4  }
   0x8   :  { %47 = dma.hbm_to_vmem [thread:$0]  %s40_s8, 2048, %s42_s12, [#allocation5], %s1597_s13, %s1597_s13, %s1598_s14  }
   0x9   :  { %1589 = dma.done.wait [#allocation3], 4096  }
   0xa   :  { %1590 = vsyncadd [#allocation3], 4294963200 }
   0xb   :  { %1591 = dma.done.wait [#allocation5], 2048  }
   0xc   :  { %1592 = vsyncadd [#allocation5], 4294965248  ;;  %v1175_v0 = vld [vmem:[%s1979_s1] sm:$0xf]  ;;  %v1382_v1 = vld [vmem:[%s1979_s1 + $0x4] sm:$0xf0] }
   0xd   :  { %v1381_v2 = vld [vmem:[%s1979_s1 + $0x4] sm:$0xf]  ;;  %v1176_v3 = vor.u32 %v1382_v1, %v1175_v0  ;;  %v1177_v4 = vld [vmem:[%s1979_s1 + $0x8] sm:$0xf0]  ;;  %v59_v5 = vld [vmem:[%s1978_s0] sm:$0x1] }
   0xe   :  { %v60_v6 = vld [vmem:[%s1978_s0 + $0x1] sm:$0x1]  ;;  %vm324_vm0 = vcmask 1041409   ;;  %v1180_v7 = vor.u32 %v1381_v2, %v1177_v4  ;;  %v61_v8 = vld [vmem:[%s1978_s0 + $0x2] sm:$0x1]  ;;  %v123_v11 = vpack.c.bf16 %v59_v5, %v59_v5  ;;  %vm327_vm1 = vcmask 1042434  }
   0xf   :  { %v62_v9 = vld [vmem:[%s1978_s0 + $0x3] sm:$0x1]  ;;  %v63_v10 = vld [vmem:[%s1978_s0 + $0x4] sm:$0x1]  ;;  %v124_v12 = vpack.c.bf16 %v60_v6, %v60_v6  ;;  %476 = vmatpush.bf16.msra.mxu0 %v1176_v3  ;;  %v64_v13 = vld [vmem:[%s1978_s0 + $0x5] sm:$0x1]  ;;  %v125_v16 = vpack.c.bf16 %v61_v8, %v61_v8 }
  0x10   :  { %v65_v14 = vld [vmem:[%s1978_s0 + $0x6] sm:$0x1]  ;;  %v66_v15 = vld [vmem:[%s1978_s0 + $0x7] sm:$0x1]  ;;  %v126_v17 = vpack.c.bf16 %v62_v9, %v62_v9  ;;  %v127_v18 = vpack.c.bf16 %v63_v10, %v63_v10  ;;  %vm330_vm2 = vcmask 1043459   ;;  %505 = vmatpush.bf16.msra.mxu1 %v1180_v7  ;;  %v128_v22 = vpack.c.bf16 %v64_v13, %v64_v13 }
  0x11   :  { %v67_v19 = vld [vmem:[%s1978_s0 + $0x8] sm:$0x1]  ;;  %v68_v20 = vld [vmem:[%s1978_s0 + $0x9] sm:$0x1]  ;;  %v69_v21 = vld [vmem:[%s1978_s0 + $0xa] sm:$0x1]  ;;  %v129_v23 = vpack.c.bf16 %v65_v14, %v65_v14  ;;  %v130_v24 = vpack.c.bf16 %v66_v15, %v66_v15  ;;  %v259_v25 = vunpack.c.l.b16 %v123_v11  ;;  %v260_v32 = vunpack.c.l.b16 %v124_v12 }
  0x12   :  { %vm333_vm3 = vcmask 1044484   ;;  %v70_v26 = vld [vmem:[%s1978_s0 + $0xb] sm:$0x1]  ;;  %v71_v27 = vld [vmem:[%s1978_s0 + $0xc] sm:$0x1]  ;;  %v131_v29 = vpack.c.bf16 %v67_v19, %v67_v19  ;;  %v132_v30 = vpack.c.bf16 %v68_v20, %v68_v20  ;;  %v133_v31 = vpack.c.bf16 %v69_v21, %v69_v21 }
  0x13   :  { %v72_v28 = vld [vmem:[%s1978_s0 + $0xd] sm:$0x1]  ;;  %vm336_vm4 = vcmask 1045509   ;;  %v73_v33 = vld [vmem:[%s1978_s0 + $0xe] sm:$0x1]  ;;  %v134_v35 = vpack.c.bf16 %v70_v26, %v70_v26  ;;  %v135_v36 = vpack.c.bf16 %v71_v27, %v71_v27  ;;  %v261_v38 = vunpack.c.l.b16 %v125_v16 }
  0x14   :  { %v74_v34 = vld [vmem:[%s1978_s0 + $0xf] sm:$0x1]  ;;  %v136_v37 = vpack.c.bf16 %v72_v28, %v72_v28  ;;  %vm339_vm5 = vcmask 1046534   ;;  %v137_v39 = vpack.c.bf16 %v73_v33, %v73_v33  ;;  %v262_v41 = vunpack.c.l.b16 %v126_v17  ;;  %v75_v59 = vld [vmem:[%s1978_s0 + $0x10] sm:$0x1] }
  0x15   :  { %v138_v40 = vpack.c.bf16 %v74_v34, %v74_v34  ;;  %v263_v42 = vunpack.c.l.b16 %v127_v18  ;;  %vm342_vm6 = vcmask 1047559   ;;  %v264_v43 = vunpack.c.l.b16 %v128_v22  ;;  %v76_v0 = vld [vmem:[%s1978_s0 + $0x11] sm:$0x1]  ;;  %v77_v5 = vld [vmem:[%s1978_s0 + $0x12] sm:$0x1] }
  0x16   :  { %v265_v44 = vunpack.c.l.b16 %v129_v23  ;;  %v266_v45 = vunpack.c.l.b16 %v130_v24  ;;  %v267_v46 = vunpack.c.l.b16 %v131_v29  ;;  %v268_v47 = vunpack.c.l.b16 %v132_v30  ;;  %v78_v10 = vld [vmem:[%s1978_s0 + $0x13] sm:$0x1]  ;;  %v79_v11 = vld [vmem:[%s1978_s0 + $0x14] sm:$0x1]  ;;  %v80_v15 = vld [vmem:[%s1978_s0 + $0x15] sm:$0x1] }
  0x17   :  { %v269_v48 = vunpack.c.l.b16 %v133_v31  ;;  %v270_v49 = vunpack.c.l.b16 %v134_v35  ;;  %v271_v50 = vunpack.c.l.b16 %v135_v36  ;;  %v272_v51 = vunpack.c.l.b16 %v136_v37  ;;  %v81_v16 = vld [vmem:[%s1978_s0 + $0x16] sm:$0x1]  ;;  %v82_v20 = vld [vmem:[%s1978_s0 + $0x17] sm:$0x1]  ;;  %v83_v21 = vld [vmem:[%s1978_s0 + $0x18] sm:$0x1] }
  0x18   :  { %v273_v52 = vunpack.c.l.b16 %v137_v39  ;;  %v274_v53 = vunpack.c.l.b16 %v138_v40  ;;  %v323_v54 = vrot.slane %v260_v32, 7  ;;  %v326_v55 = vrot.slane %v261_v38, 6  ;;  %v84_v22 = vld [vmem:[%s1978_s0 + $0x19] sm:$0x1]  ;;  %v85_v27 = vld [vmem:[%s1978_s0 + $0x1a] sm:$0x1] }
  0x19   :  { %v329_v56 = vrot.slane %v262_v41, 5  ;;  %v332_v57 = vrot.slane %v263_v42, 4  ;;  %v335_v58 = vrot.slane %v264_v43, 3  ;;  %v338_v61 = vrot.slane %v265_v44, 2  ;;  %v86_v28 = vld [vmem:[%s1978_s0 + $0x1b] sm:$0x1] }
  0x1a   :  { %v325_v60 = vsel %vm324_vm0, %v323_v54, %v259_v25  ;;  %v341_v62 = vrot.slane %v266_v45, 1  ;;  %v344_v63 = vrot.slane %v268_v47, 7  ;;  %vm456_vm7 = vcmask 130048   ;;  %v87_v29 = vld [vmem:[%s1978_s0 + $0x1c] sm:$0x1] }
  0x1b   :  { %v328_v1 = vsel %vm327_vm1, %v326_v55, %v325_v60  ;;  %v346_v2 = vrot.slane %v269_v48, 6  ;;  %v348_v3 = vrot.slane %v270_v49, 5  ;;  %v350_v4 = vrot.slane %v271_v50, 4  ;;  %v88_v34 = vld [vmem:[%s1978_s0 + $0x1d] sm:$0x1] }
  0x1c   :  { %v331_v6 = vsel %vm330_vm2, %v329_v56, %v328_v1  ;;  %v345_v7 = vsel %vm324_vm0, %v344_v63, %v267_v46  ;;  %v352_v8 = vrot.slane %v272_v51, 3  ;;  %v354_v9 = vrot.slane %v273_v52, 2  ;;  %v89_v35 = vld [vmem:[%s1978_s0 + $0x1e] sm:$0x1]  ;;  %v90_v36 = vld [vmem:[%s1978_s0 + $0x1f] sm:$0x1] }
  0x1d   :  { %v334_v12 = vsel %vm333_vm3, %v332_v57, %v331_v6  ;;  %v347_v13 = vsel %vm327_vm1, %v346_v2, %v345_v7  ;;  %v356_v14 = vrot.slane %v274_v53, 1  ;;  %v139_v17 = vpack.c.bf16 %v75_v59, %v75_v59  ;;  %v91_v7 = vld [vmem:[%s1978_s0 + $0x20] sm:$0x1] }
  0x1e   :  { %v337_v18 = vsel %vm336_vm4, %v335_v58, %v334_v12  ;;  %v349_v19 = vsel %vm330_vm2, %v348_v3, %v347_v13  ;;  %v140_v23 = vpack.c.bf16 %v76_v0, %v76_v0  ;;  %v141_v24 = vpack.c.bf16 %v77_v5, %v77_v5  ;;  %v92_v12 = vld [vmem:[%s1978_s0 + $0x21] sm:$0x1] }
  0x1f   :  { %v340_v25 = vsel %vm339_vm5, %v338_v61, %v337_v18  ;;  %v351_v26 = vsel %vm333_vm3, %v350_v4, %v349_v19  ;;  %v142_v30 = vpack.c.bf16 %v78_v10, %v78_v10  ;;  %v143_v31 = vpack.c.bf16 %v79_v11, %v79_v11 }
  0x20   :  { %v343_v32 = vsel %vm342_vm6, %v341_v62, %v340_v25  ;;  %v353_v33 = vsel %vm336_vm4, %v352_v8, %v351_v26  ;;  %v144_v37 = vpack.c.bf16 %v80_v15, %v80_v15  ;;  %v145_v38 = vpack.c.bf16 %v81_v16, %v81_v16 }
  0x21   :  { %v355_v39 = vsel %vm339_vm5, %v354_v9, %v353_v33  ;;  %v146_v40 = vpack.c.bf16 %v82_v20, %v82_v20  ;;  %v147_v41 = vpack.c.bf16 %v83_v21, %v83_v21  ;;  %v148_v42 = vpack.c.bf16 %v84_v22, %v84_v22  ;;  %v94_v22 = vld [vmem:[%s1978_s0 + $0x23] sm:$0x1]  ;;  %v99_v33 = vld [vmem:[%s1978_s0 + $0x28] sm:$0x1] }
  0x22   :  { %v357_v43 = vsel %vm342_vm6, %v356_v14, %v355_v39  ;;  %v149_v44 = vpack.c.bf16 %v85_v27, %v85_v27  ;;  %v150_v45 = vpack.c.bf16 %v86_v28, %v86_v28  ;;  %v151_v46 = vpack.c.bf16 %v87_v29, %v87_v29  ;;  %v96_v27 = vld [vmem:[%s1978_s0 + $0x25] sm:$0x1]  ;;  %v97_v28 = vld [vmem:[%s1978_s0 + $0x26] sm:$0x1]  ;;  %v101_v39 = vld [vmem:[%s1978_s0 + $0x2a] sm:$0x1] }
  0x23   :  { %v442_v47 = vpack.c.b16 %v357_v43, %v343_v32  ;;  %v152_v48 = vpack.c.bf16 %v88_v34, %v88_v34  ;;  %v153_v49 = vpack.c.bf16 %v89_v35, %v89_v35  ;;  %v154_v50 = vpack.c.bf16 %v90_v36, %v90_v36  ;;  %v98_v32 = vld [vmem:[%s1978_s0 + $0x27] sm:$0x1] }
  0x24   :  { %v275_v51 = vunpack.c.l.b16 %v139_v17  ;;  %v276_v52 = vunpack.c.l.b16 %v140_v23  ;;  %v277_v53 = vunpack.c.l.b16 %v141_v24  ;;  %v278_v54 = vunpack.c.l.b16 %v142_v30  ;;  %v93_v17 = vld [vmem:[%s1978_s0 + $0x22] sm:$0x1]  ;;  %v95_v23 = vld [vmem:[%s1978_s0 + $0x24] sm:$0x1] }
  0x25   :  { %1181 = vmatmul.msk.bf16.vlgmr.msra.gmra.mxu0 %vm456_vm7, %v442_v47  ;;  %1185 = vmatmul.msk.bf16.vlgmr.msra.gmra.mxu1 %vm456_vm7, %v442_v47  ;;  %v279_v55 = vunpack.c.l.b16 %v143_v31  ;;  %v280_v56 = vunpack.c.l.b16 %v144_v37  ;;  %v281_v57 = vunpack.c.l.b16 %v145_v38  ;;  %v282_v58 = vunpack.c.l.b16 %v146_v40  ;;  %v100_v38 = vld [vmem:[%s1978_s0 + $0x29] sm:$0x1]  ;;  %v102_v40 = vld [vmem:[%s1978_s0 + $0x2b] sm:$0x1]  ;;  %v105_v47 = vld [vmem:[%s1978_s0 + $0x2e] sm:$0x1] }
  0x26   :  { %v283_v59 = vunpack.c.l.b16 %v147_v41  ;;  %v284_v60 = vunpack.c.l.b16 %v148_v42  ;;  %v285_v61 = vunpack.c.l.b16 %v149_v44  ;;  %v286_v62 = vunpack.c.l.b16 %v150_v45  ;;  %v103_v45 = vld [vmem:[%s1978_s0 + $0x2c] sm:$0x1] }
  0x27   :  { %v287_v63 = vunpack.c.l.b16 %v151_v46  ;;  %v288_v0 = vunpack.c.l.b16 %v152_v48  ;;  %v289_v1 = vunpack.c.l.b16 %v153_v49  ;;  %v290_v2 = vunpack.c.l.b16 %v154_v50  ;;  %v104_v46 = vld [vmem:[%s1978_s0 + $0x2d] sm:$0x1] }
  0x28   :  { %v358_v3 = vrot.slane %v276_v52, 7  ;;  %v360_v4 = vrot.slane %v277_v53, 6  ;;  %v362_v5 = vrot.slane %v278_v54, 5  ;;  %v364_v6 = vrot.slane %v279_v55, 4  ;;  %v106_v52 = vld [vmem:[%s1978_s0 + $0x2f] sm:$0x1] }
  0x29   :  { %v366_v8 = vrot.slane %v280_v56, 3  ;;  %v368_v9 = vrot.slane %v281_v57, 2  ;;  %v370_v10 = vrot.slane %v282_v58, 1  ;;  %v372_v11 = vrot.slane %v284_v60, 7 }
  0x2a   :  { %v359_v13 = vsel %vm324_vm0, %v358_v3, %v275_v51  ;;  %v374_v14 = vrot.slane %v285_v61, 6  ;;  %v376_v15 = vrot.slane %v286_v62, 5  ;;  %v378_v16 = vrot.slane %v287_v63, 4 }
  0x2b   :  { %v361_v18 = vsel %vm327_vm1, %v360_v4, %v359_v13  ;;  %v373_v19 = vsel %vm324_vm0, %v372_v11, %v283_v59  ;;  %v380_v20 = vrot.slane %v288_v0, 3  ;;  %v382_v21 = vrot.slane %v289_v1, 2 }
  0x2c   :  { %v363_v24 = vsel %vm330_vm2, %v362_v5, %v361_v18  ;;  %v375_v25 = vsel %vm327_vm1, %v374_v14, %v373_v19  ;;  %v384_v26 = vrot.slane %v290_v2, 1  ;;  %v155_v29 = vpack.c.bf16 %v91_v7, %v91_v7  ;;  %v1836_v19 = vld [vmem:[%s1978_s0 + $0x30] sm:$0x1] }
  0x2d   :  { %v365_v30 = vsel %vm333_vm3, %v364_v6, %v363_v24  ;;  %v377_v31 = vsel %vm330_vm2, %v376_v15, %v375_v25  ;;  %v156_v34 = vpack.c.bf16 %v92_v12, %v92_v12  ;;  %v157_v35 = vpack.c.bf16 %v93_v17, %v93_v17 }
  0x2e   :  { %v367_v36 = vsel %vm336_vm4, %v366_v8, %v365_v30  ;;  %v379_v37 = vsel %vm333_vm3, %v378_v16, %v377_v31  ;;  %v158_v41 = vpack.c.bf16 %v94_v22, %v94_v22  ;;  %v159_v42 = vpack.c.bf16 %v95_v23, %v95_v23  ;;  %v108_v23 = vld [vmem:[%s1978_s0 + $0x31] sm:$0x1] }
  0x2f   :  { %v369_v43 = vsel %vm339_vm5, %v368_v9, %v367_v36  ;;  %v381_v44 = vsel %vm336_vm4, %v380_v20, %v379_v37  ;;  %v160_v48 = vpack.c.bf16 %v96_v27, %v96_v27  ;;  %v161_v49 = vpack.c.bf16 %v97_v28, %v97_v28  ;;  %v109_v28 = vld [vmem:[%s1978_s0 + $0x32] sm:$0x1] }
  0x30   :  { %v371_v50 = vsel %vm342_vm6, %v370_v10, %v369_v43  ;;  %v383_v51 = vsel %vm339_vm5, %v382_v21, %v381_v44  ;;  %v162_v53 = vpack.c.bf16 %v98_v32, %v98_v32  ;;  %v163_v54 = vpack.c.bf16 %v99_v33, %v99_v33  ;;  %v110_v33 = vld [vmem:[%s1978_s0 + $0x33] sm:$0x1]  ;;  %v114_v43 = vld [vmem:[%s1978_s0 + $0x37] sm:$0x1] }
  0x31   :  { %v385_v55 = vsel %vm342_vm6, %v384_v26, %v383_v51  ;;  %v164_v56 = vpack.c.bf16 %v100_v38, %v100_v38  ;;  %v165_v57 = vpack.c.bf16 %v101_v39, %v101_v39  ;;  %v166_v58 = vpack.c.bf16 %v102_v40, %v102_v40  ;;  %v111_v38 = vld [vmem:[%s1978_s0 + $0x34] sm:$0x1]  ;;  %v112_v39 = vld [vmem:[%s1978_s0 + $0x35] sm:$0x1] }
  0x32   :  { %v443_v59 = vpack.c.b16 %v385_v55, %v371_v50  ;;  %v167_v60 = vpack.c.bf16 %v103_v45, %v103_v45  ;;  %v168_v61 = vpack.c.bf16 %v104_v46, %v104_v46  ;;  %v169_v62 = vpack.c.bf16 %v105_v47, %v105_v47  ;;  %v117_v50 = vld [vmem:[%s1978_s0 + $0x3a] sm:$0x1]  ;;  %v118_v55 = vld [vmem:[%s1978_s0 + $0x3b] sm:$0x1] }
  0x33   :  { %v170_v63 = vpack.c.bf16 %v106_v52, %v106_v52  ;;  %v291_v0 = vunpack.c.l.b16 %v155_v29  ;;  %v292_v1 = vunpack.c.l.b16 %v156_v34  ;;  %v293_v2 = vunpack.c.l.b16 %v157_v35 }
  0x34   :  { %v294_v3 = vunpack.c.l.b16 %v158_v41  ;;  %v295_v4 = vunpack.c.l.b16 %v159_v42  ;;  %v296_v5 = vunpack.c.l.b16 %v160_v48  ;;  %v297_v6 = vunpack.c.l.b16 %v161_v49  ;;  %v113_v42 = vld [vmem:[%s1978_s0 + $0x36] sm:$0x1]  ;;  %v115_v48 = vld [vmem:[%s1978_s0 + $0x38] sm:$0x1]  ;;  %v116_v49 = vld [vmem:[%s1978_s0 + $0x39] sm:$0x1] }
  0x35   :  { %1182 = vmatmul.msk.bf16.gmra.mxu0 %vm456_vm7, %v443_v59  ;;  %1186 = vmatmul.msk.bf16.gmra.mxu1 %vm456_vm7, %v443_v59  ;;  %v298_v7 = vunpack.c.l.b16 %v162_v53  ;;  %v299_v8 = vunpack.c.l.b16 %v163_v54  ;;  %v300_v9 = vunpack.c.l.b16 %v164_v56  ;;  %v301_v10 = vunpack.c.l.b16 %v165_v57  ;;  %v119_v56 = vld [vmem:[%s1978_s0 + $0x3c] sm:$0x1]  ;;  %v120_v57 = vld [vmem:[%s1978_s0 + $0x3d] sm:$0x1] }
  0x36   :  { %v302_v11 = vunpack.c.l.b16 %v166_v58  ;;  %v303_v12 = vunpack.c.l.b16 %v167_v60  ;;  %v304_v13 = vunpack.c.l.b16 %v168_v61  ;;  %v305_v14 = vunpack.c.l.b16 %v169_v62  ;;  %v121_v62 = vld [vmem:[%s1978_s0 + $0x3e] sm:$0x1] }
  0x37   :  { %v306_v15 = vunpack.c.l.b16 %v170_v63  ;;  %v386_v16 = vrot.slane %v292_v1, 7  ;;  %v388_v17 = vrot.slane %v293_v2, 6  ;;  %v390_v18 = vrot.slane %v294_v3, 5  ;;  %v122_v63 = vld [vmem:[%s1978_s0 + $0x3f] sm:$0x1] }
  0x38   :  { %v392_v20 = vrot.slane %v295_v4, 4  ;;  %v394_v21 = vrot.slane %v296_v5, 3  ;;  %v396_v22 = vrot.slane %v297_v6, 2  ;;  %v400_v25 = vrot.slane %v300_v9, 7 }
  0x39   :  { %v387_v24 = vsel %vm324_vm0, %v386_v16, %v291_v0  ;;  %v402_v26 = vrot.slane %v301_v10, 6  ;;  %v404_v27 = vrot.slane %v302_v11, 5  ;;  %v398_v30 = vrot.slane %v298_v7, 1 }
  0x3a   :  { %v389_v29 = vsel %vm327_vm1, %v388_v17, %v387_v24  ;;  %v406_v31 = vrot.slane %v303_v12, 4  ;;  %v408_v32 = vrot.slane %v304_v13, 3  ;;  %v401_v35 = vsel %vm324_vm0, %v400_v25, %v299_v8 }
  0x3b   :  { %v391_v34 = vsel %vm330_vm2, %v390_v18, %v389_v29  ;;  %v410_v36 = vrot.slane %v305_v14, 2  ;;  %v412_v37 = vrot.slane %v306_v15, 1  ;;  %v403_v41 = vsel %vm327_vm1, %v402_v26, %v401_v35 }
  0x3c   :  { %v393_v40 = vsel %vm333_vm3, %v392_v20, %v391_v34  ;;  %v171_v44 = vpack.c.bf16 %v1836_v19, %v1836_v19  ;;  %v172_v45 = vpack.c.bf16 %v108_v23, %v108_v23  ;;  %v405_v47 = vsel %vm330_vm2, %v404_v27, %v403_v41 }
  0x3d   :  { %v395_v46 = vsel %vm336_vm4, %v394_v21, %v393_v40  ;;  %v173_v51 = vpack.c.bf16 %v109_v28, %v109_v28  ;;  %v174_v52 = vpack.c.bf16 %v110_v33, %v110_v33  ;;  %v407_v54 = vsel %vm333_vm3, %v406_v31, %v405_v47  ;;  %v1249_v31 = vld [vmem:[#allocation2 + $0x78] sm:$0xf0]  ;;  %v1241_v47 = vld [vmem:[#allocation2 + $0x68] sm:$0xf0] }
  0x3e   :  { %v397_v53 = vsel %vm339_vm5, %v396_v22, %v395_v46  ;;  %v175_v58 = vpack.c.bf16 %v111_v38, %v111_v38  ;;  %v176_v59 = vpack.c.bf16 %v112_v39, %v112_v39  ;;  %v409_v61 = vsel %vm336_vm4, %v408_v32, %v407_v54  ;;  %v1413_v32 = vld [vmem:[#allocation2 + $0xf4] sm:$0xf] }
  0x3f   :  { %v399_v60 = vsel %vm342_vm6, %v398_v30, %v397_v53  ;;  %v177_v0 = vpack.c.bf16 %v113_v42, %v113_v42  ;;  %v178_v1 = vpack.c.bf16 %v114_v43, %v114_v43  ;;  %v411_v2 = vsel %vm339_vm5, %v410_v36, %v409_v61  ;;  %v1397_v30 = vld [vmem:[#allocation2 + $0x74] sm:$0xf]  ;;  %v1395_v42 = vld [vmem:[#allocation2 + $0x64] sm:$0xf]  ;;  %v1305_v53 = vld [vmem:[#allocation2 + $0xe8] sm:$0xf0] }
  0x40   :  { %v179_v3 = vpack.c.bf16 %v115_v48, %v115_v48  ;;  %v180_v4 = vpack.c.bf16 %v116_v49, %v116_v49  ;;  %v181_v5 = vpack.c.bf16 %v117_v50, %v117_v50  ;;  %v413_v6 = vsel %vm342_vm6, %v412_v37, %v411_v2  ;;  %v1313_v37 = vld [vmem:[#allocation2 + $0xf8] sm:$0xf0] }
  0x41   :  { %v182_v7 = vpack.c.bf16 %v118_v55, %v118_v55  ;;  %v183_v8 = vpack.c.bf16 %v119_v56, %v119_v56  ;;  %v184_v9 = vpack.c.bf16 %v120_v57, %v120_v57  ;;  %v444_v10 = vpack.c.b16 %v413_v6, %v399_v60 }
  0x42   :  { %v185_v11 = vpack.c.bf16 %v121_v62, %v121_v62  ;;  %v186_v12 = vpack.c.bf16 %v122_v63, %v122_v63  ;;  %v308_v13 = vunpack.c.l.b16 %v172_v45  ;;  %v309_v14 = vunpack.c.l.b16 %v173_v51 }
  0x43   :  { %v310_v15 = vunpack.c.l.b16 %v174_v52  ;;  %v311_v16 = vunpack.c.l.b16 %v175_v58  ;;  %v312_v17 = vunpack.c.l.b16 %v176_v59  ;;  %v307_v18 = vunpack.c.l.b16 %v171_v44  ;;  %v1411_v52 = vld [vmem:[#allocation2 + $0xe4] sm:$0xf]  ;;  %v1247_v58 = vld [vmem:[#allocation2 + $0x70] sm:$0xf]  ;;  %v1398_v59 = vld [vmem:[#allocation2 + $0x74] sm:$0xf0] }
  0x44   :  { %v313_v19 = vunpack.c.l.b16 %v177_v0  ;;  %v314_v20 = vunpack.c.l.b16 %v178_v1  ;;  %v316_v21 = vunpack.c.l.b16 %v180_v4  ;;  %v315_v22 = vunpack.c.l.b16 %v179_v3  ;;  %v1311_v0 = vld [vmem:[#allocation2 + $0xf0] sm:$0xf]  ;;  %v1414_v1 = vld [vmem:[#allocation2 + $0xf4] sm:$0xf0] }
  0x45   :  { %1183 = vmatmul.msk.bf16.gmra.mxu0 %vm456_vm7, %v444_v10  ;;  %1187 = vmatmul.msk.bf16.gmra.mxu1 %vm456_vm7, %v444_v10  ;;  %v317_v23 = vunpack.c.l.b16 %v181_v5  ;;  %v318_v24 = vunpack.c.l.b16 %v182_v7  ;;  %v319_v25 = vunpack.c.l.b16 %v183_v8  ;;  %v320_v26 = vunpack.c.l.b16 %v184_v9  ;;  %v1393_v7 = vld [vmem:[#allocation2 + $0x54] sm:$0xf]  ;;  %v1233_v8 = vld [vmem:[#allocation2 + $0x58] sm:$0xf0] }
  0x46   :  { %v321_v27 = vunpack.c.l.b16 %v185_v11  ;;  %v414_v28 = vrot.slane %v308_v13, 7  ;;  %v416_v29 = vrot.slane %v309_v14, 6  ;;  %v322_v33 = vunpack.c.l.b16 %v186_v12  ;;  %v1409_v10 = vld [vmem:[#allocation2 + $0xd4] sm:$0xf]  ;;  %v1297_v11 = vld [vmem:[#allocation2 + $0xd8] sm:$0xf0] }
  0x47   :  { %v418_v34 = vrot.slane %v310_v15, 5  ;;  %v420_v35 = vrot.slane %v311_v16, 4  ;;  %v422_v36 = vrot.slane %v312_v17, 3  ;;  %v424_v39 = vrot.slane %v313_v19, 2  ;;  %v1239_v14 = vld [vmem:[#allocation2 + $0x60] sm:$0xf] }
  0x48   :  { %v415_v38 = vsel %vm324_vm0, %v414_v28, %v307_v18  ;;  %v428_v40 = vrot.slane %v316_v21, 7  ;;  %v430_v41 = vrot.slane %v317_v23, 6  ;;  %v426_v44 = vrot.slane %v314_v20, 1  ;;  %v1396_v16 = vld [vmem:[#allocation2 + $0x64] sm:$0xf0] }
  0x49   :  { %v417_v43 = vsel %vm327_vm1, %v416_v29, %v415_v38  ;;  %v432_v45 = vrot.slane %v318_v24, 5  ;;  %v434_v46 = vrot.slane %v319_v25, 4  ;;  %v436_v50 = vrot.slane %v320_v26, 3  ;;  %v1303_v17 = vld [vmem:[#allocation2 + $0xe0] sm:$0xf] }
  0x4a   :  { %v419_v48 = vsel %vm330_vm2, %v418_v34, %v417_v43  ;;  %v429_v49 = vsel %vm324_vm0, %v428_v40, %v315_v22  ;;  %v438_v51 = vrot.slane %v321_v27, 2  ;;  %v1252_v56 = vor.u32 %v1397_v30, %v1249_v31  ;;  %v1412_v18 = vld [vmem:[#allocation2 + $0xe4] sm:$0xf0]  ;;  %v1391_v22 = vld [vmem:[#allocation2 + $0x44] sm:$0xf] }
  0x4b   :  { %v421_v54 = vsel %vm333_vm3, %v420_v35, %v419_v48  ;;  %v431_v55 = vsel %vm327_vm1, %v430_v41, %v429_v49  ;;  %v1316_v57 = vor.u32 %v1413_v32, %v1313_v37  ;;  %v440_v62 = vrot.slane %v322_v33, 1  ;;  %v1225_v23 = vld [vmem:[#allocation2 + $0x48] sm:$0xf0]  ;;  %v1407_v24 = vld [vmem:[#allocation2 + $0xc4] sm:$0xf] }
  0x4c   :  { %v423_v60 = vsel %vm336_vm4, %v422_v36, %v421_v54  ;;  %v433_v61 = vsel %vm330_vm2, %v432_v45, %v431_v55  ;;  %v1244_v63 = vor.u32 %v1395_v42, %v1241_v47  ;;  %831 = vmatpush.bf16.msrb.mxu0 %v1252_v56  ;;  %v1308_v4 = vor.u32 %v1411_v52, %v1305_v53  ;;  %v1289_v25 = vld [vmem:[#allocation2 + $0xc8] sm:$0xf0]  ;;  %v1231_v30 = vld [vmem:[#allocation2 + $0x50] sm:$0xf]  ;;  %v1394_v31 = vld [vmem:[#allocation2 + $0x54] sm:$0xf0] }
  0x4d   :  { %v425_v2 = vsel %vm339_vm5, %v424_v39, %v423_v60  ;;  %v435_v3 = vsel %vm333_vm3, %v434_v46, %v433_v61  ;;  %860 = vmatpush.bf16.msrb.mxu1 %v1316_v57  ;;  %v1248_v12 = vor.u32 %v1398_v59, %v1247_v58  ;;  %v1312_v13 = vor.u32 %v1414_v1, %v1311_v0  ;;  %v1295_v32 = vld [vmem:[#allocation2 + $0xd0] sm:$0xf]  ;;  %v1410_v34 = vld [vmem:[#allocation2 + $0xd4] sm:$0xf0]  ;;  %v1389_v36 = vld [vmem:[#allocation2 + $0x34] sm:$0xf] }
  0x4e   :  { %v427_v5 = vsel %vm342_vm6, %v426_v44, %v425_v2  ;;  %v437_v6 = vsel %vm336_vm4, %v436_v50, %v435_v3  ;;  %v1236_v20 = vor.u32 %v1393_v7, %v1233_v8  ;;  %v1300_v21 = vor.u32 %v1409_v10, %v1297_v11  ;;  %v1217_v37 = vld [vmem:[#allocation2 + $0x38] sm:$0xf0]  ;;  %v1405_v39 = vld [vmem:[#allocation2 + $0xb4] sm:$0xf]  ;;  %v1223_v41 = vld [vmem:[#allocation2 + $0x40] sm:$0xf] }
  0x4f   :  { %v439_v9 = vsel %vm339_vm5, %v438_v51, %v437_v6  ;;  %773 = vmatpush.bf16.msra.mxu2 %v1248_v12  ;;  %802 = vmatpush.bf16.msra.mxu3 %v1312_v13  ;;  %v1240_v26 = vor.u32 %v1396_v16, %v1239_v14  ;;  %v1304_v27 = vor.u32 %v1412_v18, %v1303_v17  ;;  %v1281_v40 = vld [vmem:[#allocation2 + $0xb8] sm:$0xf0]  ;;  %v1392_v43 = vld [vmem:[#allocation2 + $0x44] sm:$0xf0]  ;;  %v1287_v44 = vld [vmem:[#allocation2 + $0xc0] sm:$0xf] }
  0x50   :  { %v441_v15 = vsel %vm342_vm6, %v440_v62, %v439_v9  ;;  %832 = vmatpush.bf16.msrb.mxu0 %v1244_v63  ;;  %v1228_v28 = vor.u32 %v1391_v22, %v1225_v23  ;;  %v1292_v29 = vor.u32 %v1407_v24, %v1289_v25  ;;  %v1232_v33 = vor.u32 %v1394_v31, %v1231_v30  ;;  %v1408_v45 = vld [vmem:[#allocation2 + $0xc4] sm:$0xf0]  ;;  %v1215_v48 = vld [vmem:[#allocation2 + $0x30] sm:$0xf]  ;;  %v1390_v49 = vld [vmem:[#allocation2 + $0x34] sm:$0xf0] }
  0x51   :  { %v445_v19 = vpack.c.b16 %v441_v15, %v427_v5  ;;  %861 = vmatpush.bf16.msrb.mxu1 %v1308_v4  ;;  %v1296_v35 = vor.u32 %v1410_v34, %v1295_v32  ;;  %v1220_v38 = vor.u32 %v1389_v36, %v1217_v37  ;;  %v1284_v42 = vor.u32 %v1405_v39, %v1281_v40  ;;  %v1279_v50 = vld [vmem:[#allocation2 + $0xb0] sm:$0xf]  ;;  %v1406_v52 = vld [vmem:[#allocation2 + $0xb4] sm:$0xf0]  ;;  %v1387_v54 = vld [vmem:[#allocation2 + $0x24] sm:$0xf] }
  0x52   :  { %v1224_v46 = vor.u32 %v1392_v43, %v1223_v41  ;;  %v1288_v47 = vor.u32 %v1408_v45, %v1287_v44  ;;  %v1216_v51 = vor.u32 %v1390_v49, %v1215_v48  ;;  %v1280_v53 = vor.u32 %v1406_v52, %v1279_v50  ;;  %v1209_v55 = vld [vmem:[#allocation2 + $0x28] sm:$0xf0]  ;;  %v1403_v56 = vld [vmem:[#allocation2 + $0xa4] sm:$0xf]  ;;  %v1207_v59 = vld [vmem:[#allocation2 + $0x20] sm:$0xf] }
  0x53   :  { %774 = vmatpush.bf16.msra.mxu2 %v1240_v26  ;;  %803 = vmatpush.bf16.msra.mxu3 %v1304_v27  ;;  %v1212_v57 = vor.u32 %v1387_v54, %v1209_v55  ;;  %v1273_v58 = vld [vmem:[#allocation2 + $0xa8] sm:$0xf0]  ;;  %v1388_v60 = vld [vmem:[#allocation2 + $0x24] sm:$0xf0]  ;;  %v1271_v63 = vld [vmem:[#allocation2 + $0xa0] sm:$0xf] }
  0x54   :  { %833 = vmatpush.bf16.msrb.mxu0 %v1236_v20  ;;  %v1276_v61 = vor.u32 %v1403_v56, %v1273_v58  ;;  %v1208_v62 = vor.u32 %v1388_v60, %v1207_v59  ;;  %v1404_v0 = vld [vmem:[#allocation2 + $0xa4] sm:$0xf0]  ;;  %v1385_v2 = vld [vmem:[#allocation2 + $0x14] sm:$0xf]  ;;  %v1201_v3 = vld [vmem:[#allocation2 + $0x18] sm:$0xf0] }
  0x55   :  { %1184 = vmatmul.msk.bf16.gmra.mxu0 %vm456_vm7, %v445_v19  ;;  %1188 = vmatmul.msk.bf16.gmra.mxu1 %vm456_vm7, %v445_v19  ;;  %v1272_v1 = vor.u32 %v1404_v0, %v1271_v63  ;;  %v1199_v4 = vld [vmem:[#allocation2 + $0x10] sm:$0xf]  ;;  %v1204_v5 = vor.u32 %v1385_v2, %v1201_v3  ;;  %v1386_v6 = vld [vmem:[#allocation2 + $0x14] sm:$0xf0]  ;;  %v1401_v11 = vld [vmem:[#allocation2 + $0x94] sm:$0xf] }
  0x56   :  { %862 = vmatpush.bf16.msrb.mxu1 %v1300_v21  ;;  %v1263_v7 = vld [vmem:[#allocation2 + $0x90] sm:$0xf]  ;;  %v1402_v8 = vld [vmem:[#allocation2 + $0x94] sm:$0xf0]  ;;  %v1200_v9 = vor.u32 %v1386_v6, %v1199_v4  ;;  %v1265_v12 = vld [vmem:[#allocation2 + $0x98] sm:$0xf0] }
  0x57   :  { %775 = vmatpush.bf16.msra.mxu2 %v1232_v33  ;;  %804 = vmatpush.bf16.msra.mxu3 %v1296_v35  ;;  %v1264_v10 = vor.u32 %v1402_v8, %v1263_v7  ;;  %v1191_v13 = vld [vmem:[#allocation2] sm:$0xf]  ;;  %v1268_v14 = vor.u32 %v1401_v11, %v1265_v12  ;;  %v1384_v15 = vld [vmem:[#allocation2 + $0x4] sm:$0xf0]  ;;  %v1383_v19 = vld [vmem:[#allocation2 + $0x4] sm:$0xf] }
  0x58   :  { %834 = vmatpush.bf16.msrb.mxu0 %v1228_v28  ;;  %v1255_v16 = vld [vmem:[#allocation2 + $0x80] sm:$0xf]  ;;  %v1400_v17 = vld [vmem:[#allocation2 + $0x84] sm:$0xf0]  ;;  %v1192_v18 = vor.u32 %v1384_v15, %v1191_v13  ;;  %v1193_v20 = vld [vmem:[#allocation2 + $0x8] sm:$0xf0] }
  0x59   :  { %v1399_v21 = vld [vmem:[#allocation2 + $0x84] sm:$0xf]  ;;  %v1256_v22 = vor.u32 %v1400_v17, %v1255_v16  ;;  %v1196_v23 = vor.u32 %v1383_v19, %v1193_v20  ;;  %v1257_v24 = vld [vmem:[#allocation2 + $0x88] sm:$0xf0]  ;;  %v189_v28 = vld [vmem:[%s1980_s2] sm:$0x3] }
  0x5a   :  { %863 = vmatpush.bf16.msrb.mxu1 %v1292_v29  ;;  %v1260_v25 = vor.u32 %v1399_v21, %v1257_v24  ;;  %v1920_v29 = vperm.slane %v189_v28, 0  ;;  %v1922_v30 = vperm.slane %v189_v28, 1  ;;  %v1422_v15 = vld [vmem:[#allocation4 + $0x38] sm:$0xff]  ;;  %v1421_v20 = vld [vmem:[#allocation4 + $0x30] sm:$0xff] }
  0x5b   :  { %776 = vmatpush.bf16.msra.mxu2 %v1224_v46  ;;  %805 = vmatpush.bf16.msra.mxu3 %v1288_v47  ;;  %v1430_v16 = vld [vmem:[#allocation4 + $0x78] sm:$0xff]  ;;  %v1429_v21 = vld [vmem:[#allocation4 + $0x70] sm:$0xff] }
  0x5c   :  { %835 = vmatpush.bf16.msrb.mxu0 %v1220_v38 }
  0x5e   :  { %864 = vmatpush.bf16.msrb.mxu1 %v1284_v42 }
  0x5f   :  { %777 = vmatpush.bf16.msra.mxu2 %v1216_v51  ;;  %806 = vmatpush.bf16.msra.mxu3 %v1280_v53 }
  0x60   :  { %836 = vmatpush.bf16.msrb.mxu0 %v1212_v57 }
  0x62   :  { %865 = vmatpush.bf16.msrb.mxu1 %v1276_v61 }
  0x63   :  { %778 = vmatpush.bf16.msra.mxu2 %v1208_v62  ;;  %807 = vmatpush.bf16.msra.mxu3 %v1272_v1 }
  0x64   :  { %837 = vmatpush.bf16.msrb.mxu0 %v1204_v5 }
  0x66   :  { %866 = vmatpush.bf16.msrb.mxu1 %v1268_v14 }
  0x67   :  { %779 = vmatpush.bf16.msra.mxu2 %v1200_v9  ;;  %808 = vmatpush.bf16.msra.mxu3 %v1264_v10 }
  0x68   :  { %838 = vmatpush.bf16.msrb.mxu0 %v1196_v23 }
  0x6a   :  { %867 = vmatpush.bf16.msrb.mxu1 %v1260_v25  ;;  %v1420_v25 = vld [vmem:[#allocation4 + $0x28] sm:$0xff] }
  0x6b   :  { %780 = vmatpush.bf16.msra.mxu2 %v1192_v18  ;;  %809 = vmatpush.bf16.msra.mxu3 %v1256_v22 }
  0x6f   :  { %1069 = vmatpush.bf16.msrb.mxu2 %v1422_v15  ;;  %1098 = vmatpush.bf16.msrb.mxu3 %v1430_v16 }
  0x73   :  { %1070 = vmatpush.bf16.msrb.mxu2 %v1421_v20  ;;  %1099 = vmatpush.bf16.msrb.mxu3 %v1429_v21 }
  0x77   :  { %1071 = vmatpush.bf16.msrb.mxu2 %v1420_v25 }
  0xa2   :  { %v478_v26 = vpop.f32.mrf.mxu0  ;;  %v507_v27 = vpop.f32.mrf.mxu1 }
  0xa3   :  { %v479_v33 = vadd.f32 %v478_v26, %v1920_v29  ;;  %v508_v34 = vadd.f32 %v507_v27, %v1922_v30  ;;  %v1428_v26 = vld [vmem:[#allocation4 + $0x68] sm:$0xff] }
  0xa4   :  { %1100 = vmatpush.bf16.msrb.mxu3 %v1428_v26 }
  0xaa   :  { %v480_v31 = vpop.f32.mrf.mxu0  ;;  %v509_v32 = vpop.f32.mrf.mxu1 }
  0xab   :  { %v481_v35 = vadd.f32 %v480_v31, %v1920_v29  ;;  %v510_v36 = vadd.f32 %v509_v32, %v1922_v30  ;;  %v1419_v31 = vld [vmem:[#allocation4 + $0x20] sm:$0xff] }
  0xac   :  { %v1427_v32 = vld [vmem:[#allocation4 + $0x60] sm:$0xff]  ;;  %1072 = vmatpush.bf16.msrb.mxu2 %v1419_v31 }
  0xad   :  { %v527_v37 = vpack.c.bf16 %v481_v35, %v479_v33  ;;  %v528_v38 = vpack.c.bf16 %v510_v36, %v508_v34  ;;  %1101 = vmatpush.bf16.msrb.mxu3 %v1427_v32 }
  0xaf   :  { %v535_v39 = vunpack.c.l.bf16 %v527_v37  ;;  %v537_v40 = vunpack.c.h.bf16 %v527_v37  ;;  %v536_v41 = vunpack.c.l.bf16 %v528_v38  ;;  %v538_v42 = vunpack.c.h.bf16 %v528_v38 }
  0xb1   :  { %1461 = vtanh.f32 %v535_v39 }
  0xb2   :  { %1463 = vtanh.f32 %v537_v40  ;;  %v483_v43 = vpop.f32.mrf.mxu0  ;;  %v512_v44 = vpop.f32.mrf.mxu1 }
  0xb3   :  { %1465 = vtanh.f32 %v536_v41  ;;  %v484_v50 = vadd.f32 %v483_v43, %v1920_v29  ;;  %v513_v51 = vadd.f32 %v512_v44, %v1922_v30 }
  0xb4   :  { %1467 = vtanh.f32 %v538_v42 }
  0xb7   :  { %v1462_v45 = vpop.eup %1461 }
  0xb8   :  { %v1464_v46 = vpop.eup %1463 }
  0xb9   :  { %v1466_v47 = vpop.eup %1465  ;;  %v567_v48 = vpack.c.bf16 %v1464_v46, %v1462_v45 }
  0xba   :  { %v1468_v49 = vpop.eup %1467  ;;  %v485_v52 = vpop.f32.mrf.mxu0 }
  0xbb   :  { %v514_v53 = vpop.f32.mrf.mxu1  ;;  %v486_v54 = vadd.f32 %v485_v52, %v1920_v29  ;;  %781 = vmatmul.bf16.vlgmr.msra.gmra.mxu2 %v567_v48  ;;  %v568_v56 = vpack.c.bf16 %v1468_v49, %v1466_v47  ;;  %839 = vmatmul.bf16.vlgmr.msrb.gmra.mxu0 %v567_v48 }
  0xbc   :  { %v515_v55 = vadd.f32 %v514_v53, %v1922_v30  ;;  %v1418_v53 = vld [vmem:[#allocation4 + $0x18] sm:$0xff] }
  0xbd   :  { %v529_v57 = vpack.c.bf16 %v486_v54, %v484_v50  ;;  %810 = vmatmul.bf16.vlgmr.msra.gmra.mxu3 %v568_v56  ;;  %868 = vmatmul.bf16.vlgmr.msrb.gmra.mxu1 %v568_v56  ;;  %v1426_v54 = vld [vmem:[#allocation4 + $0x58] sm:$0xff]  ;;  %v1417_v56 = vld [vmem:[#allocation4 + $0x10] sm:$0xff] }
  0xbe   :  { %v530_v58 = vpack.c.bf16 %v515_v55, %v513_v51  ;;  %1073 = vmatpush.bf16.msrb.mxu2 %v1418_v53  ;;  %1102 = vmatpush.bf16.msrb.mxu3 %v1426_v54  ;;  %v1425_v55 = vld [vmem:[#allocation4 + $0x50] sm:$0xff] }
  0xbf   :  { %v539_v59 = vunpack.c.l.bf16 %v529_v57  ;;  %v541_v60 = vunpack.c.h.bf16 %v529_v57  ;;  %v1424_v57 = vld [vmem:[#allocation4 + $0x48] sm:$0xff] }
  0xc0   :  { %v540_v61 = vunpack.c.l.bf16 %v530_v58  ;;  %v542_v62 = vunpack.c.h.bf16 %v530_v58  ;;  %v1423_v58 = vld [vmem:[#allocation4 + $0x40] sm:$0xff] }
  0xc1   :  { %1469 = vtanh.f32 %v539_v59  ;;  %v1416_v59 = vld [vmem:[#allocation4 + $0x8] sm:$0xff] }
  0xc2   :  { %1471 = vtanh.f32 %v541_v60  ;;  %v488_v63 = vpop.f32.mrf.mxu0  ;;  %1103 = vmatpush.bf16.msrb.mxu3 %v1425_v55  ;;  %1074 = vmatpush.bf16.msrb.mxu2 %v1417_v56  ;;  %v1415_v60 = vld [vmem:[#allocation4] sm:$0xff] }
  0xc3   :  { %v517_v0 = vpop.f32.mrf.mxu1  ;;  %1473 = vtanh.f32 %v540_v61  ;;  %v489_v6 = vadd.f32 %v488_v63, %v1920_v29  ;;  %v607_v61 = vld [vmem:[%s1982_s4] sm:$0x3] }
  0xc4   :  { %1475 = vtanh.f32 %v542_v62  ;;  %v518_v7 = vadd.f32 %v517_v0, %v1922_v30  ;;  %v1943_v0 = vperm.slane %v607_v61, 1 }
  0xc6   :  { %1104 = vmatpush.bf16.msrb.mxu3 %v1424_v57  ;;  %1075 = vmatpush.bf16.msrb.mxu2 %v1416_v59 }
  0xc7   :  { %v1470_v1 = vpop.eup %1469 }
  0xc8   :  { %v1472_v2 = vpop.eup %1471 }
  0xc9   :  { %v1474_v3 = vpop.eup %1473  ;;  %v569_v4 = vpack.c.bf16 %v1472_v2, %v1470_v1 }
  0xca   :  { %v1476_v5 = vpop.eup %1475  ;;  %v490_v8 = vpop.f32.mrf.mxu0  ;;  %1105 = vmatpush.bf16.msrb.mxu3 %v1423_v58  ;;  %1076 = vmatpush.bf16.msrb.mxu2 %v1415_v60 }
  0xcb   :  { %v519_v9 = vpop.f32.mrf.mxu1  ;;  %v491_v10 = vadd.f32 %v490_v8, %v1920_v29  ;;  %786 = vmatmul.bf16.gmra.mxu2 %v569_v4  ;;  %v570_v12 = vpack.c.bf16 %v1476_v5, %v1474_v3  ;;  %844 = vmatmul.bf16.gmra.mxu0 %v569_v4  ;;  %v1946_v5 = vperm.slane %v607_v61, 0 }
  0xcc   :  { %v520_v11 = vadd.f32 %v519_v9, %v1922_v30 }
  0xcd   :  { %v531_v13 = vpack.c.bf16 %v491_v10, %v489_v6  ;;  %815 = vmatmul.bf16.gmra.mxu3 %v570_v12  ;;  %873 = vmatmul.bf16.gmra.mxu1 %v570_v12 }
  0xce   :  { %v532_v14 = vpack.c.bf16 %v520_v11, %v518_v7 }
  0xcf   :  { %v543_v17 = vunpack.c.l.bf16 %v531_v13  ;;  %v545_v18 = vunpack.c.h.bf16 %v531_v13 }
  0xd0   :  { %v544_v19 = vunpack.c.l.bf16 %v532_v14  ;;  %v546_v22 = vunpack.c.h.bf16 %v532_v14 }
  0xd1   :  { %1477 = vtanh.f32 %v543_v17 }
  0xd2   :  { %1479 = vtanh.f32 %v545_v18  ;;  %v493_v23 = vpop.f32.mrf.mxu0 }
  0xd3   :  { %v522_v24 = vpop.f32.mrf.mxu1  ;;  %1481 = vtanh.f32 %v544_v19  ;;  %v494_v36 = vadd.f32 %v493_v23, %v1920_v29 }
  0xd4   :  { %1483 = vtanh.f32 %v546_v22  ;;  %v523_v37 = vadd.f32 %v522_v24, %v1922_v30 }
  0xd7   :  { %v1478_v27 = vpop.eup %1477 }
  0xd8   :  { %v1480_v28 = vpop.eup %1479 }
  0xd9   :  { %v1482_v33 = vpop.eup %1481  ;;  %v571_v34 = vpack.c.bf16 %v1480_v28, %v1478_v27 }
  0xda   :  { %v1484_v35 = vpop.eup %1483  ;;  %v495_v38 = vpop.f32.mrf.mxu0 }
  0xdb   :  { %v524_v39 = vpop.f32.mrf.mxu1  ;;  %v496_v40 = vadd.f32 %v495_v38, %v1920_v29  ;;  %791 = vmatmul.bf16.gmra.mxu2 %v571_v34  ;;  %v572_v42 = vpack.c.bf16 %v1484_v35, %v1482_v33  ;;  %849 = vmatmul.bf16.gmra.mxu0 %v571_v34 }
  0xdc   :  { %v525_v41 = vadd.f32 %v524_v39, %v1922_v30 }
  0xdd   :  { %v533_v43 = vpack.c.bf16 %v496_v40, %v494_v36  ;;  %820 = vmatmul.bf16.gmra.mxu3 %v572_v42  ;;  %878 = vmatmul.bf16.gmra.mxu1 %v572_v42 }
  0xde   :  { %v534_v44 = vpack.c.bf16 %v525_v41, %v523_v37 }
  0xdf   :  { %v547_v45 = vunpack.c.l.bf16 %v533_v43  ;;  %v549_v46 = vunpack.c.h.bf16 %v533_v43 }
  0xe0   :  { %v548_v47 = vunpack.c.l.bf16 %v534_v44  ;;  %v550_v48 = vunpack.c.h.bf16 %v534_v44 }
  0xe1   :  { %1485 = vtanh.f32 %v547_v45 }
  0xe2   :  { %1487 = vtanh.f32 %v549_v46 }
  0xe3   :  { %1489 = vtanh.f32 %v548_v47 }
  0xe4   :  { %1491 = vtanh.f32 %v550_v48 }
  0xe7   :  { %v1486_v29 = vpop.eup %1485 }
  0xe8   :  { %v1488_v49 = vpop.eup %1487 }
  0xe9   :  { %v1490_v30 = vpop.eup %1489  ;;  %v573_v50 = vpack.c.bf16 %v1488_v49, %v1486_v29 }
  0xea   :  { %v1492_v51 = vpop.eup %1491 }
  0xeb   :  { %796 = vmatmul.bf16.gmra.mxu2 %v573_v50  ;;  %v574_v52 = vpack.c.bf16 %v1492_v51, %v1490_v30  ;;  %854 = vmatmul.bf16.gmra.mxu0 %v573_v50 }
  0xed   :  { %825 = vmatmul.bf16.gmra.mxu3 %v574_v52  ;;  %883 = vmatmul.bf16.gmra.mxu1 %v574_v52 }
 0x138   :  { %v840_v62 = vpop.f32.mrf.mxu0 }
 0x139   :  { %v841_v2 = vadd.f32 %v840_v62, %v1943_v0 }
 0x13a   :  { %v869_v63 = vpop.f32.mrf.mxu1 }
 0x13b   :  { %v870_v8 = vadd.f32 %v869_v63, %v841_v2 }
 0x13e   :  { %v782_v1 = vpop.f32.mrf.mxu2 }
 0x13f   :  { %v783_v10 = vadd.f32 %v782_v1, %v1946_v5 }
 0x140   :  { %v811_v3 = vpop.f32.mrf.mxu3  ;;  %v842_v4 = vpop.f32.mrf.mxu0 }
 0x141   :  { %v843_v6 = vadd.f32 %v842_v4, %v1943_v0  ;;  %v812_v18 = vadd.f32 %v811_v3, %v783_v10 }
 0x142   :  { %v871_v7 = vpop.f32.mrf.mxu1 }
 0x143   :  { %v872_v9 = vadd.f32 %v871_v7, %v843_v6 }
 0x145   :  { %v890_v11 = vpack.c.bf16 %v872_v9, %v870_v8 }
 0x146   :  { %v784_v12 = vpop.f32.mrf.mxu2 }
 0x147   :  { %v898_v13 = vunpack.c.l.bf16 %v890_v11  ;;  %v900_v14 = vunpack.c.h.bf16 %v890_v11  ;;  %v785_v15 = vadd.f32 %v784_v12, %v1946_v5 }
 0x148   :  { %v813_v16 = vpop.f32.mrf.mxu3  ;;  %v845_v17 = vpop.f32.mrf.mxu0 }
 0x149   :  { %1493 = vtanh.f32 %v898_v13  ;;  %v814_v19 = vadd.f32 %v813_v16, %v785_v15  ;;  %v846_v26 = vadd.f32 %v845_v17, %v1943_v0 }
 0x14a   :  { %1495 = vtanh.f32 %v900_v14  ;;  %v874_v20 = vpop.f32.mrf.mxu1 }
 0x14b   :  { %v889_v21 = vpack.c.bf16 %v814_v19, %v812_v18  ;;  %v875_v35 = vadd.f32 %v874_v20, %v846_v26 }
 0x14d   :  { %v897_v22 = vunpack.c.l.bf16 %v889_v21  ;;  %v899_v23 = vunpack.c.h.bf16 %v889_v21 }
 0x14e   :  { %v787_v24 = vpop.f32.mrf.mxu2 }
 0x14f   :  { %v1494_v25 = vpop.eup %1493  ;;  %1497 = vtanh.f32 %v897_v22  ;;  %v788_v38 = vadd.f32 %v787_v24, %v1946_v5 }
 0x150   :  { %v1496_v27 = vpop.eup %1495  ;;  %1499 = vtanh.f32 %v899_v23  ;;  %v816_v28 = vpop.f32.mrf.mxu3 }
 0x151   :  { %v847_v31 = vpop.f32.mrf.mxu0  ;;  %v930_v33 = vpack.c.bf16 %v1496_v27, %v1494_v25  ;;  %v817_v48 = vadd.f32 %v816_v28, %v788_v38 }
 0x152   :  { %v848_v32 = vadd.f32 %v847_v31, %v1943_v0  ;;  %v876_v34 = vpop.f32.mrf.mxu1 }
 0x153   :  { %1106 = vmatmul.bf16.vlgmr.msrb.gmra.mxu3 %v930_v33 }
 0x154   :  { %v877_v36 = vadd.f32 %v876_v34, %v848_v32 }
 0x155   :  { %v1498_v37 = vpop.eup %1497 }
 0x156   :  { %v892_v39 = vpack.c.bf16 %v877_v36, %v875_v35  ;;  %v1500_v40 = vpop.eup %1499  ;;  %v789_v41 = vpop.f32.mrf.mxu2 }
 0x157   :  { %v790_v44 = vadd.f32 %v789_v41, %v1946_v5  ;;  %v929_v45 = vpack.c.bf16 %v1500_v40, %v1498_v37 }
 0x158   :  { %v902_v42 = vunpack.c.l.bf16 %v892_v39  ;;  %v904_v43 = vunpack.c.h.bf16 %v892_v39  ;;  %v818_v46 = vpop.f32.mrf.mxu3 }
 0x159   :  { %v850_v47 = vpop.f32.mrf.mxu0  ;;  %v819_v29 = vadd.f32 %v818_v46, %v790_v44  ;;  %1077 = vmatmul.bf16.vlgmr.msrb.gmra.mxu2 %v929_v45 }
 0x15a   :  { %1501 = vtanh.f32 %v902_v42  ;;  %v879_v49 = vpop.f32.mrf.mxu1  ;;  %v851_v54 = vadd.f32 %v850_v47, %v1943_v0 }
 0x15b   :  { %1503 = vtanh.f32 %v904_v43  ;;  %v891_v30 = vpack.c.bf16 %v819_v29, %v817_v48 }
 0x15c   :  { %v880_v61 = vadd.f32 %v879_v49, %v851_v54 }
 0x15d   :  { %v901_v50 = vunpack.c.l.bf16 %v891_v30  ;;  %v903_v51 = vunpack.c.h.bf16 %v891_v30  ;;  %v1460_v30 = vld [vmem:[%s1984_s6] ss:$0 sm:$0xff] }
 0x15e   :  { %v792_v52 = vpop.f32.mrf.mxu2 }
 0x15f   :  { %1505 = vtanh.f32 %v901_v50  ;;  %v793_v1 = vadd.f32 %v792_v52, %v1946_v5 }
 0x160   :  { %v1502_v53 = vpop.eup %1501  ;;  %1507 = vtanh.f32 %v903_v51  ;;  %v821_v56 = vpop.f32.mrf.mxu3 }
 0x161   :  { %v1504_v55 = vpop.eup %1503  ;;  %v852_v57 = vpop.f32.mrf.mxu0  ;;  %v822_v12 = vadd.f32 %v821_v56, %v793_v1 }
 0x162   :  { %v853_v58 = vadd.f32 %v852_v57, %v1943_v0  ;;  %v932_v59 = vpack.c.bf16 %v1504_v55, %v1502_v53  ;;  %v881_v60 = vpop.f32.mrf.mxu1 }
 0x164   :  { %v882_v62 = vadd.f32 %v881_v60, %v853_v58  ;;  %1111 = vmatmul.bf16.gmra.mxu3 %v932_v59 }
 0x165   :  { %v1506_v63 = vpop.eup %1505 }
 0x166   :  { %v894_v2 = vpack.c.bf16 %v882_v62, %v880_v61  ;;  %v1508_v3 = vpop.eup %1507  ;;  %v794_v4 = vpop.f32.mrf.mxu2 }
 0x167   :  { %v795_v8 = vadd.f32 %v794_v4, %v1946_v5  ;;  %v931_v9 = vpack.c.bf16 %v1508_v3, %v1506_v63 }
 0x168   :  { %v906_v6 = vunpack.c.l.bf16 %v894_v2  ;;  %v908_v7 = vunpack.c.h.bf16 %v894_v2  ;;  %v823_v10 = vpop.f32.mrf.mxu3 }
 0x169   :  { %v855_v11 = vpop.f32.mrf.mxu0  ;;  %v824_v13 = vadd.f32 %v823_v10, %v795_v8  ;;  %1082 = vmatmul.bf16.gmra.mxu2 %v931_v9 }
 0x16a   :  { %1509 = vtanh.f32 %v906_v6  ;;  %v884_v14 = vpop.f32.mrf.mxu1  ;;  %v856_v20 = vadd.f32 %v855_v11, %v1943_v0 }
 0x16b   :  { %1511 = vtanh.f32 %v908_v7  ;;  %v893_v15 = vpack.c.bf16 %v824_v13, %v822_v12 }
 0x16c   :  { %v885_v27 = vadd.f32 %v884_v14, %v856_v20 }
 0x16d   :  { %v905_v16 = vunpack.c.l.bf16 %v893_v15  ;;  %v907_v17 = vunpack.c.h.bf16 %v893_v15 }
 0x16e   :  { %v797_v18 = vpop.f32.mrf.mxu2 }
 0x16f   :  { %1513 = vtanh.f32 %v905_v16  ;;  %v798_v32 = vadd.f32 %v797_v18, %v1946_v5 }
 0x170   :  { %v1510_v19 = vpop.eup %1509  ;;  %1515 = vtanh.f32 %v907_v17  ;;  %v826_v22 = vpop.f32.mrf.mxu3 }
 0x171   :  { %v1512_v21 = vpop.eup %1511  ;;  %v857_v23 = vpop.f32.mrf.mxu0  ;;  %v827_v41 = vadd.f32 %v826_v22, %v798_v32 }
 0x172   :  { %v858_v24 = vadd.f32 %v857_v23, %v1943_v0  ;;  %v934_v25 = vpack.c.bf16 %v1512_v21, %v1510_v19  ;;  %v886_v26 = vpop.f32.mrf.mxu1 }
 0x174   :  { %v887_v28 = vadd.f32 %v886_v26, %v858_v24  ;;  %1116 = vmatmul.bf16.gmra.mxu3 %v934_v25 }
 0x175   :  { %v1514_v31 = vpop.eup %1513 }
 0x176   :  { %v896_v33 = vpack.c.bf16 %v887_v28, %v885_v27  ;;  %v1516_v34 = vpop.eup %1515  ;;  %v799_v35 = vpop.f32.mrf.mxu2 }
 0x177   :  { %v800_v38 = vadd.f32 %v799_v35, %v1946_v5  ;;  %v933_v39 = vpack.c.bf16 %v1516_v34, %v1514_v31 }
 0x178   :  { %v910_v36 = vunpack.c.l.bf16 %v896_v33  ;;  %v912_v37 = vunpack.c.h.bf16 %v896_v33  ;;  %v828_v40 = vpop.f32.mrf.mxu3 }
 0x179   :  { %v829_v0 = vadd.f32 %v828_v40, %v800_v38  ;;  %1087 = vmatmul.bf16.gmra.mxu2 %v933_v39 }
 0x17a   :  { %1517 = vtanh.f32 %v910_v36 }
 0x17b   :  { %1519 = vtanh.f32 %v912_v37  ;;  %v895_v42 = vpack.c.bf16 %v829_v0, %v827_v41 }
 0x17d   :  { %v909_v43 = vunpack.c.l.bf16 %v895_v42  ;;  %v911_v44 = vunpack.c.h.bf16 %v895_v42 }
 0x17f   :  { %1521 = vtanh.f32 %v909_v43 }
 0x180   :  { %v1518_v45 = vpop.eup %1517  ;;  %1523 = vtanh.f32 %v911_v44 }
 0x181   :  { %v1520_v46 = vpop.eup %1519 }
 0x182   :  { %v936_v47 = vpack.c.bf16 %v1520_v46, %v1518_v45 }
 0x184   :  { %1121 = vmatmul.bf16.gmra.mxu3 %v936_v47 }
 0x185   :  { %v1522_v48 = vpop.eup %1521 }
 0x186   :  { %v1524_v29 = vpop.eup %1523 }
 0x187   :  { %v935_v49 = vpack.c.bf16 %v1524_v29, %v1522_v48 }
 0x189   :  { %1092 = vmatmul.bf16.gmra.mxu2 %v935_v49 }
 0x1d6   :  { %v1107_v5 = vpop.f32.mrf.mxu3 }
 0x1dc   :  { %v1078_v50 = vpop.f32.mrf.mxu2 }
 0x1dd   :  { %v1079_v51 = vadd.f32 %v1460_v30, %v1078_v50 }
 0x1de   :  { %v1109_v52 = vpop.f32.mrf.mxu3 }
 0x1df   :  { %v1108_v53 = vadd.f32 %v1107_v5, %v1079_v51 }
 0x1e1   :  { %v1127_v54 = vpack.c.bf16 %v1108_v53, %v1108_v53 }
 0x1e3   :  { %v1135_v59 = vunpack.c.l.bf16 %v1127_v54 }
 0x1e4   :  { %v1080_v55 = vpop.f32.mrf.mxu2 }
 0x1e5   :  { %v1081_v56 = vadd.f32 %v1460_v30, %v1080_v55  ;;  %1525 = vtanh.f32 %v1135_v59 }
 0x1e7   :  { %v1112_v57 = vpop.f32.mrf.mxu3  ;;  %v1110_v58 = vadd.f32 %v1109_v52, %v1081_v56 }
 0x1e9   :  { %v1128_v60 = vpack.c.bf16 %v1110_v58, %v1110_v58 }
 0x1eb   :  { %v1136_v61 = vunpack.c.l.bf16 %v1128_v60  ;;  %v1526_v3 = vpop.eup %1525 }
 0x1ec   :  { %v1083_v62 = vpop.f32.mrf.mxu2 }
 0x1ed   :  { %1527 = vtanh.f32 %v1136_v61  ;;  %v1084_v63 = vadd.f32 %v1460_v30, %v1083_v62 }
 0x1ef   :  { %v1114_v1 = vpop.f32.mrf.mxu3  ;;  %v1113_v2 = vadd.f32 %v1112_v57, %v1084_v63 }
 0x1f1   :  { %v1129_v7 = vpack.c.bf16 %v1113_v2, %v1113_v2 }
 0x1f3   :  { %v1528_v4 = vpop.eup %1527  ;;  %v1137_v11 = vunpack.c.l.bf16 %v1129_v7 }
 0x1f4   :  { %v1434_v6 = vpack.c.bf16 %v1528_v4, %v1526_v3  ;;  %v1085_v8 = vpop.f32.mrf.mxu2 }
 0x1f5   :  { %v1086_v9 = vadd.f32 %v1460_v30, %v1085_v8  ;;  %1529 = vtanh.f32 %v1137_v11 }
 0x1f6   :  { %1435 = vst [vmem:[%s1985_s7] sm:$0xff] %v1434_v6  }
 0x1f7   :  { %v1115_v10 = vadd.f32 %v1114_v1, %v1086_v9  ;;  %v1117_v12 = vpop.f32.mrf.mxu3 }
 0x1f9   :  { %v1130_v13 = vpack.c.bf16 %v1115_v10, %v1115_v10 }
 0x1fb   :  { %v1138_v14 = vunpack.c.l.bf16 %v1130_v13  ;;  %v1530_v18 = vpop.eup %1529 }
 0x1fc   :  { %v1088_v15 = vpop.f32.mrf.mxu2 }
 0x1fd   :  { %1531 = vtanh.f32 %v1138_v14  ;;  %v1089_v16 = vadd.f32 %v1460_v30, %v1088_v15 }
 0x1ff   :  { %v1118_v17 = vadd.f32 %v1117_v12, %v1089_v16  ;;  %v1119_v19 = vpop.f32.mrf.mxu3 }
 0x201   :  { %v1131_v22 = vpack.c.bf16 %v1118_v17, %v1118_v17 }
 0x203   :  { %v1532_v20 = vpop.eup %1531  ;;  %v1139_v26 = vunpack.c.l.bf16 %v1131_v22 }
 0x204   :  { %v1439_v21 = vpack.c.bf16 %v1532_v20, %v1530_v18  ;;  %v1090_v23 = vpop.f32.mrf.mxu2 }
 0x205   :  { %v1091_v24 = vadd.f32 %v1460_v30, %v1090_v23  ;;  %1533 = vtanh.f32 %v1139_v26 }
 0x206   :  { %1451 = vst [vmem:[%s1985_s7 + $0x8] sm:$0xff] %v1439_v21  }
 0x207   :  { %v1120_v25 = vadd.f32 %v1119_v19, %v1091_v24  ;;  %v1122_v31 = vpop.f32.mrf.mxu3 }
 0x209   :  { %v1132_v27 = vpack.c.bf16 %v1120_v25, %v1120_v25 }
 0x20b   :  { %v1140_v28 = vunpack.c.l.bf16 %v1132_v27  ;;  %v1534_v35 = vpop.eup %1533 }
 0x20c   :  { %v1093_v32 = vpop.f32.mrf.mxu2 }
 0x20d   :  { %1535 = vtanh.f32 %v1140_v28  ;;  %v1094_v33 = vadd.f32 %v1460_v30, %v1093_v32 }
 0x20f   :  { %v1123_v34 = vadd.f32 %v1122_v31, %v1094_v33  ;;  %v1124_v41 = vpop.f32.mrf.mxu3 }
 0x211   :  { %v1133_v38 = vpack.c.bf16 %v1123_v34, %v1123_v34 }
 0x213   :  { %v1536_v36 = vpop.eup %1535  ;;  %v1141_v42 = vunpack.c.l.bf16 %v1133_v38 }
 0x214   :  { %v1444_v37 = vpack.c.bf16 %v1536_v36, %v1534_v35  ;;  %v1095_v39 = vpop.f32.mrf.mxu2 }
 0x215   :  { %v1096_v40 = vadd.f32 %v1460_v30, %v1095_v39  ;;  %1537 = vtanh.f32 %v1141_v42 }
 0x216   :  { %1452 = vst [vmem:[%s1985_s7 + $0x10] sm:$0xff] %v1444_v37  }
 0x217   :  { %v1125_v0 = vadd.f32 %v1124_v41, %v1096_v40 }
 0x219   :  { %v1134_v43 = vpack.c.bf16 %v1125_v0, %v1125_v0 }
 0x21b   :  { %v1142_v44 = vunpack.c.l.bf16 %v1134_v43  ;;  %v1538_v45 = vpop.eup %1537 }
 0x21d   :  { %1539 = vtanh.f32 %v1142_v44 }
 0x223   :  { %v1540_v46 = vpop.eup %1539 }
 0x224   :  { %v1449_v47 = vpack.c.bf16 %v1540_v46, %v1538_v45 }
 0x226   :  { %1453 = vst [vmem:[%s1985_s7 + $0x18] sm:$0xff] %v1449_v47  }
 0x227   :  { %1171 = vsyncpa [#allocation3], 1 }
 0x228   :  { %1172 = vsyncpa [#allocation5], 1 }

</bundles_post_ra>
